<compile_context>
chip_gen: v6e
topology: v6e:2x2x1
jax: 0.10.0
libtpu: 0.0.40
codegen_flags: <defaults>
</compile_context>

<pallas_src>
import functools
import math

import jax
import jax.numpy as jnp
from jax.experimental import pallas as pl
from jax.experimental.pallas import tpu as pltpu


def _cdiv(a, b):
    return -(-a // b)


def _round_up(a, b):
    return _cdiv(a, b) * b


def _sublane_count(dtype):
    itemsize = jnp.dtype(dtype).itemsize
    return max(8, 32 // max(1, itemsize))   # f32 -> 8, bf16 -> 16, int8 -> 32


def _vmem_capacity_bytes():
    try:
        info = pltpu.get_tpu_info()
        for name in ("vmem_capacity_bytes", "vmem_bytes"):
            cap = getattr(info, name, None)
            if cap:
                return int(cap)
    except Exception:
        pass
    return 64 * 1024 * 1024   # conservative: v7x has 64 MiB VMEM per TensorCore


def _dice_partial_kernel(p_ref, t_ref, i_ref, u_ref, *, power):
    """One (C*R, n_tile) tile: accumulate lane-reduced partial sums.

    i_ref / u_ref are (C*R, 1) f32 output blocks resident in VMEM across the
    'arbitrary' reduction axis (index_map independent of k).
    """
    k = pl.program_id(1)

    @pl.when(k == 0)
    def _init():
        i_ref[...] = jnp.zeros_like(i_ref)
        u_ref[...] = jnp.zeros_like(u_ref)

    p = p_ref[...].astype(jnp.float32)
    t = t_ref[...].astype(jnp.float32)

    # intersection partial: p * t
    pt = p * t

    # union partial: p^power + t^power (integer powers -> VALU multiplies only)
    if power == 1:
        pw = p + t
    elif power == 2:
        pw = p * p + t * t
    elif power == 3:
        pw = p * p * p + t * t * t
    elif power == 4:
        p2 = p * p
        t2 = t * t
        pw = p2 * p2 + t2 * t2
    else:
        pw = jnp.power(p, power) + jnp.power(t, power)

    # Cross-lane reduce (XLU slot) per step into tiny resident accumulators;
    # no full-width read-modify-write of a (C, n_tile) scratch.
    i_ref[...] += jnp.sum(pt, axis=1, keepdims=True)
    u_ref[...] += jnp.sum(pw, axis=1, keepdims=True)


def sample_wise_binary_dice_loss(predict, target, smooth=1e-07, p=2,
                                 reduction="mean", lane_tile=None):
    assert predict.shape == target.shape, (
        f"predict {predict.shape} & target {target.shape} do not match")
    if reduction not in ("mean", "sum", "none"):
        raise Exception("Unexpected reduction {}".format(reduction))

    C, H, W = predict.shape
    N = H * W

    it_p = jnp.dtype(predict.dtype).itemsize
    it_t = jnp.dtype(target.dtype).itemsize
    eb_max = max(it_p, it_t)

    # ---- sublane repack factor R: C*R multiple of the native sublane count.
    sub = max(_sublane_count(predict.dtype), _sublane_count(target.dtype))
    R = sub // math.gcd(C, sub)
    c_pack = C * R
    m_raw = _cdiv(N, R)           # per packed-row length before padding

    # ---- VMEM plan: 2 inputs x 2 pipeline buffers of (c_pack, n_tile).
    cap = _vmem_capacity_bytes()
    plan = min(48 << 20, int(cap * 0.6))
    per_block_budget = plan // 4
    budget_tile = max(128, (per_block_budget // (c_pack * eb_max)) // 128 * 128)
    if lane_tile is not None:                      # test/tuning override
        budget_tile = max(128, (int(lane_tile) // 128) * 128)
    n_tile = min(budget_tile, _round_up(m_raw, 128))

    num_tiles = _cdiv(m_raw, n_tile)
    # Leading "parallel" axis: splits the reduction across v7x's 2 TensorCores
    # (harmless serial outer loop on v5e/v6e).
    P = 2 if num_tiles >= 2 else 1
    kb = _cdiv(num_tiles, P)
    # Shrink the tile so P*kb tiles cover m_raw with minimal zero padding.
    n_tile = min(n_tile, _round_up(_cdiv(m_raw, P * kb), 128))
    M = P * kb * n_tile           # padded per packed-row length

    # ---- wrapper-side flatten / zero-pad / repack (zeros add 0 to both sums
    #      for p > 0, so no per-step mask is ever needed in the kernel).
    pred2d = predict.reshape(C, N)
    targ2d = target.reshape(C, N)
    pad = R * M - N
    if pad:
        pred2d = jnp.pad(pred2d, ((0, 0), (0, pad)))
        targ2d = jnp.pad(targ2d, ((0, 0), (0, pad)))
    pred2d = pred2d.reshape(c_pack, M)
    targ2d = targ2d.reshape(c_pack, M)

    vmem_needed = 2 * c_pack * n_tile * (it_p + it_t) + (2 << 20)
    vmem_limit = int(min(cap, max(vmem_needed, 16 << 20)))

    cost = pl.CostEstimate(
        flops=int(8 * c_pack * M),
        transcendentals=0 if p in (1, 2, 3, 4) else int(2 * c_pack * M),
        bytes_accessed=int(c_pack * M * (it_p + it_t) + 8 * P * c_pack),
    )

    kernel = functools.partial(_dice_partial_kernel, power=p)

    i_part, u_part = pl.pallas_call(
        kernel,
        out_shape=(
            jax.ShapeDtypeStruct((P, c_pack, 1), jnp.float32),
            jax.ShapeDtypeStruct((P, c_pack, 1), jnp.float32),
        ),
        grid_spec=pltpu.PrefetchScalarGridSpec(
            num_scalar_prefetch=0,
            grid=(P, kb),
            in_specs=[
                pl.BlockSpec((c_pack, n_tile),
                             lambda s, k, kb=kb: (0, s * kb + k)),
                pl.BlockSpec((c_pack, n_tile),
                             lambda s, k, kb=kb: (0, s * kb + k)),
            ],
            out_specs=[
                pl.BlockSpec((None, c_pack, 1), lambda s, k: (s, 0, 0)),
                pl.BlockSpec((None, c_pack, 1), lambda s, k: (s, 0, 0)),
            ],
        ),
        compiler_params=pltpu.CompilerParams(
            dimension_semantics=("parallel", "arbitrary"),
            vmem_limit_bytes=vmem_limit,
        ),
        cost_estimate=cost,
    )(pred2d, targ2d)

    # Tiny O(C) epilogue: fold the P halves and R packed sub-rows back per
    # channel, then dice ratio + reduction (as recommended for partial sums).
    inter_sum = jnp.sum(i_part.reshape(P, C, R), axis=(0, 2))   # (C,)
    union_sum = jnp.sum(u_part.reshape(P, C, R), axis=(0, 2))   # (C,)
    intersection = 2.0 * inter_sum + smooth
    union = union_sum + smooth
    loss = 1.0 - intersection / union
    if reduction == "mean":
        return loss.mean()
    if reduction == "sum":
        return loss.sum()
    return loss


def _reference_dice(predict, target, smooth=1e-07, p=2, reduction="mean"):
    C = predict.shape[0]
    pr = predict.reshape(C, -1).astype(jnp.float32)
    tg = target.reshape(C, -1).astype(jnp.float32)
    inter = 2.0 * jnp.sum(pr * tg, axis=1) + smooth
    union = jnp.sum(pr ** p + tg ** p, axis=1) + smooth
    loss = 1.0 - inter / union
    if reduction == "mean":
        return loss.mean()
    if reduction == "sum":
        return loss.sum()
    return loss


if __name__ == "__main__":
    key = jax.random.PRNGKey(0)
    k1, k2 = jax.random.split(key)

    # ---- main case: C=4, 16x16 (exact repack, no padding, single tile)
    C, H, W = 4, 16, 16
    predict = jax.nn.sigmoid(jax.random.normal(k1, (C, H, W), dtype=jnp.float32))
    target = (jax.random.uniform(k2, (C, H, W)) > 0.5).astype(jnp.float32)

    loss = jax.block_until_ready(sample_wise_binary_dice_loss(predict, target))
    ref = _reference_dice(predict, target)
    assert jnp.allclose(loss, ref, atol=1e-5, rtol=1e-5), (loss, ref)

    loss_n = jax.block_until_ready(
        sample_wise_binary_dice_loss(predict, target, reduction="none"))
    ref_n = _reference_dice(predict, target, reduction="none")
    assert jnp.allclose(loss_n, ref_n, atol=1e-5, rtol=1e-5), (loss_n, ref_n)

    # ---- odd shape: exercises the zero-pad path (C=3 -> R=8, N=1320)
    C2, H2, W2 = 3, 40, 33
    p2 = jax.nn.sigmoid(jax.random.normal(k1, (C2, H2, W2), dtype=jnp.float32))
    t2 = (jax.random.uniform(k2, (C2, H2, W2)) > 0.5).astype(jnp.float32)
    l2 = jax.block_until_ready(
        sample_wise_binary_dice_loss(p2, t2, reduction="sum"))
    r2 = _reference_dice(p2, t2, reduction="sum")
    assert jnp.allclose(l2, r2, atol=1e-5, rtol=1e-5), (l2, r2)

    # ---- forced small lane tile: exercises multi-step grid + P=2 parallel halves
    C3, H3, W3 = 2, 32, 32
    p3 = jax.nn.sigmoid(jax.random.normal(k1, (C3, H3, W3), dtype=jnp.float32))
    t3 = (jax.random.uniform(k2, (C3, H3, W3)) > 0.5).astype(jnp.float32)
    l3 = jax.block_until_ready(
        sample_wise_binary_dice_loss(p3, t3, reduction="none", lane_tile=128))
    r3 = _reference_dice(p3, t3, reduction="none")
    assert jnp.allclose(l3, r3, atol=1e-5, rtol=1e-5), (l3, r3)

    print("KERNEL_OK")
</pallas_src>

<mosaic_0001>
module attributes {stable_mosaic.version = 11 : i64} {
  func.func @_dice_partial_kernel(%arg0: i32, %arg1: i32, %arg2: memref<8x128xf32, #tpu.memory_space<vmem>>, %arg3: memref<8x128xf32, #tpu.memory_space<vmem>>, %arg4: memref<1x8x1xf32, #tpu.memory_space<vmem>>, %arg5: memref<1x8x1xf32, #tpu.memory_space<vmem>>) attributes {dimension_semantics = [#tpu.dimension_semantics<parallel>, #tpu.dimension_semantics<arbitrary>], iteration_bounds = array<i64: 1, 1>, scalar_prefetch = 0 : i64, scratch_operands = 0 : i64, tpu.core_type = #tpu.core_type<tc>, window_params = [{transform_indices = @transform_0, window_bounds = array<i64: 8, 128>}, {transform_indices = @transform_1, window_bounds = array<i64: 8, 128>}, {transform_indices = @transform_2, window_bounds = array<i64: 1, 8, 1>}, {transform_indices = @transform_3, window_bounds = array<i64: 1, 8, 1>}]} {
    %c0_i32 = arith.constant 0 : i32
    %0 = arith.cmpi eq, %arg1, %c0_i32 : i32
    %1 = arith.extui %0 : i1 to i32
    %c0_i32_0 = arith.constant 0 : i32
    %2 = arith.cmpi ne, %1, %c0_i32_0 : i32
    scf.if %2 {
      %cst_17 = arith.constant 0.000000e+00 : f32
      %25 = vector.broadcast %cst_17 : f32 to vector<8x1xf32>
      %c0_18 = arith.constant 0 : index
      %c0_19 = arith.constant 0 : index
      %c0_20 = arith.constant 0 : index
      %26 = vector.load %arg4[%c0_18, %c0_19, %c0_20] : memref<1x8x1xf32, #tpu.memory_space<vmem>>, vector<1x8x1xf32>
      %27 = vector.shape_cast %26 : vector<1x8x1xf32> to vector<8x1xf32>
      %28 = vector.shape_cast %25 : vector<8x1xf32> to vector<1x8x1xf32>
      tpu.vector_store %arg4[%c0_18, %c0_19, %c0_20], %28 {strides = array<i32>} : memref<1x8x1xf32, #tpu.memory_space<vmem>>, vector<1x8x1xf32>,
      %cst_21 = arith.constant 0.000000e+00 : f32
      %29 = vector.broadcast %cst_21 : f32 to vector<8x1xf32>
      %c0_22 = arith.constant 0 : index
      %c0_23 = arith.constant 0 : index
      %c0_24 = arith.constant 0 : index
      %30 = vector.load %arg5[%c0_22, %c0_23, %c0_24] : memref<1x8x1xf32, #tpu.memory_space<vmem>>, vector<1x8x1xf32>
      %31 = vector.shape_cast %30 : vector<1x8x1xf32> to vector<8x1xf32>
      %32 = vector.shape_cast %29 : vector<8x1xf32> to vector<1x8x1xf32>
      tpu.vector_store %arg5[%c0_22, %c0_23, %c0_24], %32 {strides = array<i32>} : memref<1x8x1xf32, #tpu.memory_space<vmem>>, vector<1x8x1xf32>,
    } else {
    }
    %c0 = arith.constant 0 : index
    %c0_1 = arith.constant 0 : index
    %3 = vector.load %arg2[%c0, %c0_1] : memref<8x128xf32, #tpu.memory_space<vmem>>, vector<8x128xf32>
    %c0_2 = arith.constant 0 : index
    %c0_3 = arith.constant 0 : index
    %4 = vector.load %arg3[%c0_2, %c0_3] : memref<8x128xf32, #tpu.memory_space<vmem>>, vector<8x128xf32>
    %5 = arith.mulf %3, %4 : vector<8x128xf32>
    %6 = arith.mulf %3, %3 : vector<8x128xf32>
    %7 = arith.mulf %4, %4 : vector<8x128xf32>
    %8 = arith.addf %6, %7 : vector<8x128xf32>
    %c0_4 = arith.constant 0 : index
    %c0_5 = arith.constant 0 : index
    %c0_6 = arith.constant 0 : index
    %9 = vector.load %arg4[%c0_4, %c0_5, %c0_6] : memref<1x8x1xf32, #tpu.memory_space<vmem>>, vector<1x8x1xf32>
    %10 = vector.shape_cast %9 : vector<1x8x1xf32> to vector<8x1xf32>
    %cst = arith.constant dense<0.000000e+00> : vector<8xf32>
    %11 = vector.multi_reduction <add>, %5, %cst [1] : vector<8x128xf32> to vector<8xf32>
    %12 = vector.shape_cast %11 : vector<8xf32> to vector<8x1xf32>
    %13 = arith.addf %10, %12 : vector<8x1xf32>
    %c0_7 = arith.constant 0 : index
    %c0_8 = arith.constant 0 : index
    %c0_9 = arith.constant 0 : index
    %14 = vector.load %arg4[%c0_7, %c0_8, %c0_9] : memref<1x8x1xf32, #tpu.memory_space<vmem>>, vector<1x8x1xf32>
    %15 = vector.shape_cast %14 : vector<1x8x1xf32> to vector<8x1xf32>
    %16 = vector.shape_cast %13 : vector<8x1xf32> to vector<1x8x1xf32>
    tpu.vector_store %arg4[%c0_7, %c0_8, %c0_9], %16 {strides = array<i32>} : memref<1x8x1xf32, #tpu.memory_space<vmem>>, vector<1x8x1xf32>,
    %c0_10 = arith.constant 0 : index
    %c0_11 = arith.constant 0 : index
    %c0_12 = arith.constant 0 : index
    %17 = vector.load %arg5[%c0_10, %c0_11, %c0_12] : memref<1x8x1xf32, #tpu.memory_space<vmem>>, vector<1x8x1xf32>
    %18 = vector.shape_cast %17 : vector<1x8x1xf32> to vector<8x1xf32>
    %cst_13 = arith.constant dense<0.000000e+00> : vector<8xf32>
    %19 = vector.multi_reduction <add>, %8, %cst_13 [1] : vector<8x128xf32> to vector<8xf32>
    %20 = vector.shape_cast %19 : vector<8xf32> to vector<8x1xf32>
    %21 = arith.addf %18, %20 : vector<8x1xf32>
    %c0_14 = arith.constant 0 : index
    %c0_15 = arith.constant 0 : index
    %c0_16 = arith.constant 0 : index
    %22 = vector.load %arg5[%c0_14, %c0_15, %c0_16] : memref<1x8x1xf32, #tpu.memory_space<vmem>>, vector<1x8x1xf32>
    %23 = vector.shape_cast %22 : vector<1x8x1xf32> to vector<8x1xf32>
    %24 = vector.shape_cast %21 : vector<8x1xf32> to vector<1x8x1xf32>
    tpu.vector_store %arg5[%c0_14, %c0_15, %c0_16], %24 {strides = array<i32>} : memref<1x8x1xf32, #tpu.memory_space<vmem>>, vector<1x8x1xf32>,
    return
  }
  func.func @transform_0(%arg0: i32, %arg1: i32) -> (i32, i32) {
    %c1_i32 = arith.constant 1 : i32
    %0 = arith.muli %arg0, %c1_i32 : i32
    %1 = arith.addi %0, %arg1 : i32
    %c0_i32 = arith.constant 0 : i32
    %c0_i32_0 = arith.constant 0 : i32
    return %c0_i32, %1 : i32, i32
  }
  func.func @transform_1(%arg0: i32, %arg1: i32) -> (i32, i32) {
    %c1_i32 = arith.constant 1 : i32
    %0 = arith.muli %arg0, %c1_i32 : i32
    %1 = arith.addi %0, %arg1 : i32
    %c0_i32 = arith.constant 0 : i32
    %c0_i32_0 = arith.constant 0 : i32
    return %c0_i32, %1 : i32, i32
  }
  func.func @transform_2(%arg0: i32, %arg1: i32) -> (i32, i32, i32) {
    %c0_i32 = arith.constant 0 : i32
    %c0_i32_0 = arith.constant 0 : i32
    %c0_i32_1 = arith.constant 0 : i32
    return %arg0, %c0_i32, %c0_i32_0 : i32, i32, i32
  }
  func.func @transform_3(%arg0: i32, %arg1: i32) -> (i32, i32, i32) {
    %c0_i32 = arith.constant 0 : i32
    %c0_i32_0 = arith.constant 0 : i32
    %c0_i32_1 = arith.constant 0 : i32
    return %arg0, %c0_i32, %c0_i32_0 : i32, i32, i32
  }
}

</mosaic_0001>

<bundles_post_ra>
// kernel: tpu_custom_call.1
= control target key start
LH: loop header
LB: loop body
LE: loop exit
PB: predicated region body
PF: predicated region fallthrough
CT: control target
= control target key end

     0   :  { %9 = vsyncpa [#allocation3], 0  ;;  %s177_s0 = inlined_call_operand.hbm [shape: f32[8,128], index: 0, kind: input, shape index: {}]   ;;  %s178_s1 = inlined_call_operand.hbm [shape: f32[8,128], index: 1, kind: input, shape index: {}]   ;;  %s179_s2 = inlined_call_operand.vmem [shape: f32[1,8,1], index: 2, kind: output, shape index: {0}]   ;;  %s180_s3 = inlined_call_operand.vmem [shape: f32[1,8,1], index: 3, kind: output, shape index: {1}]  }
   0x1   :  { %10 = vsyncpa [#allocation5], 0  ;;  %s126_s12 = smov [#allocation2]   ;;  %s127_s14 = smov [#allocation4]  }
   0x2   :  { %s20_s13 = sshll.u32 %s126_s12, 4  ;;  %s33_s15 = sshll.u32 %s127_s14, 4  ;;  %s21_s13 = int_to_ptr.vmem [resolvable:$true] %s20_s13  ;;  %s34_s15 = int_to_ptr.vmem [resolvable:$true] %s33_s15 }
   0x3   :  { %s90_s16 = scalar_lea.vmem %s21_s13, 128  ;;  %p95_p1 = scmp.lt.s32.totalorder %s21_s13, %s21_s13 }
   0x4   :  { %p91_p0 = scmp.ne.s32.totalorder %s21_s13, %s90_s16  ;;  %p96_p2 = scmp.lt.s32.totalorder %s90_s16, %s90_s16 }
   0x6   :  { %p97_p3 = por %p96_p2, %p95_p1 }
   0x8   :  { %p98_p4 = pnand %p97_p3, %p91_p0 }
   0xa   :  { %101 = shalt.err (!%p98_p4)
}
   0xb   :  { %23 = dma.hbm_to_vmem [thread:$0]  %s177_s0, 128, %s21_s13, [#allocation3]  }
   0xc   :  { %s110_s19 = scalar_lea.vmem %s34_s15, 128  ;;  %p115_p6 = scmp.lt.s32.totalorder %s34_s15, %s34_s15 }
   0xd   :  { %p111_p5 = scmp.ne.s32.totalorder %s34_s15, %s110_s19  ;;  %p116_p7 = scmp.lt.s32.totalorder %s110_s19, %s110_s19 }
   0xf   :  { %p117_p8 = por %p116_p7, %p115_p6 }
  0x11   :  { %p118_p9 = pnand %p117_p8, %p111_p5 }
  0x13   :  { %121 = shalt.err (!%p118_p9)
}
  0x14   :  { %36 = dma.hbm_to_vmem [thread:$0]  %s178_s1, 128, %s34_s15, [#allocation5]  }
  0x15   :  { %122 = dma.done.wait [#allocation3], 128  }
  0x16   :  { %123 = vsyncadd [#allocation3], 4294967168 }
  0x17   :  { %124 = dma.done.wait [#allocation5], 128  }
  0x18   :  { %125 = vsyncadd [#allocation5], 4294967168  ;;  %vm49_vm0 = vcmask 7168   ;;  %v128_v0 = vmov 0.0   ;;  %v52_v1 = vld [vmem:[#allocation2] sm:$0xff]  ;;  %v53_v2 = vld [vmem:[#allocation4] sm:$0xff] }
  0x19   :  { %50 = vst.msk [vmem:[%s179_s2] sm:$0xff] %vm49_vm0, %v128_v0  ;;  %51 = vst.msk [vmem:[%s180_s3] sm:$0xff] %vm49_vm0, %v128_v0  ;;  %v54_v3 = vmul.f32 %v53_v2, %v52_v1  ;;  %v55_v4 = vmul.f32 %v52_v1, %v52_v1  ;;  %v56_v5 = vmul.f32 %v53_v2, %v53_v2 }
  0x1b   :  { %59 = vadd.xlane.f32.xlu0 %v54_v3  ;;  %v57_v6 = vadd.f32 %v56_v5, %v55_v4 }
  0x1f   :  { %65 = vadd.xlane.f32.xlu0 %v57_v6 }
  0x20   :  { %v58_v7 = vld [vmem:[%s179_s2] sm:$0xff] }
  0x21   :  { %v64_v10 = vld [vmem:[%s180_s3] sm:$0xff] }
  0xa4   :  { %v60_v8 = vpop.xlane.xlu0 %59 }
  0xa5   :  { %v61_v9 = vadd.f32 %v60_v8, %v58_v7 }
  0xa7   :  { %63 = vst.msk [vmem:[%s179_s2] sm:$0xff] %vm49_vm0, %v61_v9 }
  0xa8   :  { %v66_v11 = vpop.xlane.xlu0 %65 }
  0xa9   :  { %v67_v12 = vadd.f32 %v66_v11, %v64_v10 }
  0xab   :  { %68 = vst.msk [vmem:[%s180_s3] sm:$0xff] %vm49_vm0, %v67_v12 }
  0xac   :  { %77 = vsyncpa [#allocation3], 1 }
  0xad   :  { %78 = vsyncpa [#allocation5], 1 }

</bundles_post_ra>
